<compile_context>
chip_gen: v7x
topology: tpu7x:2x2x1
jax: 0.10.0
libtpu: 0.0.40
codegen_flags: <defaults>
</compile_context>

<pallas_src>
import jax
import jax.numpy as jnp
from jax.experimental import pallas as pl
from jax.experimental.pallas import tpu as pltpu

LANE = 128
NEG_PAD = -1e30  # bias for padded logit lanes -> exp() == 0 inside log_softmax


def _round_up(n, m):
    return (n + m - 1) // m * m


def _pad_to(a, shape, fill=0.0):
    out = jnp.full(shape, fill, a.dtype)
    return out.at[tuple(slice(0, s) for s in a.shape)].set(a)


def _rnn_seq_kernel(x_ref, h1_0_ref, h2_0_ref,
                    w1x_ref, w1h_ref, b1_ref,
                    w2h1_ref, w2h2_ref, b2_ref,
                    w3_ref, b3_ref,
                    op_ref, hid1_ref, hid2_ref,
                    h1_s, h2_s):
    t = pl.program_id(1)

    # Load the initial hidden state into the VMEM carry at the first time step
    # of every batch block.
    @pl.when(t == 0)
    def _():
        h1_s[...] = h1_0_ref[...]
        h2_s[...] = h2_0_ref[...]

    x = x_ref[0]
    h1 = h1_s[...]
    h2 = h2_s[...]

    # fc1(cat(x, h1)) == x @ W1x + h1 @ W1h + b1
    hid1 = (jnp.dot(x, w1x_ref[...], preferred_element_type=jnp.float32)
            + jnp.dot(h1, w1h_ref[...], preferred_element_type=jnp.float32)
            + b1_ref[...])

    # fc2(cat(hid1, h2)) == hid1 @ W2a + h2 @ W2b + b2
    hid2 = (jnp.dot(hid1, w2h1_ref[...], preferred_element_type=jnp.float32)
            + jnp.dot(h2, w2h2_ref[...], preferred_element_type=jnp.float32)
            + b2_ref[...])

    # fc3 + log_softmax over the feature (lane) axis.  Padded lanes carry a
    # -1e30 bias, so max/sum-exp are unaffected by padding.
    logits = (jnp.dot(hid2, w3_ref[...], preferred_element_type=jnp.float32)
              + b3_ref[...])
    m = jnp.max(logits, axis=1, keepdims=True)
    s = logits - m
    lse = jnp.log(jnp.sum(jnp.exp(s), axis=1, keepdims=True))

    op_ref[0] = s - lse
    hid1_ref[0] = hid1
    hid2_ref[0] = hid2

    # Carry for the next time step (stays in VMEM scratch).
    h1_s[...] = hid1
    h2_s[...] = hid2


def rnn_forward_sequence(xs, h1, h2, params, *, batch_block=None):
    """Runs the RNN cell over a whole sequence in one fused Pallas kernel.

    xs: (T, B, inp), h1: (B, hid1), h2: (B, hid2).
    params: merged nn.Linear-style weights, already transposed to
        (in_features, out_features):
        (w1 (inp+hid1, hid1), b1 (1, hid1),
         w2 (hid1+hid2, hid2), b2 (1, hid2),
         w3 (hid2, op),        b3 (1, op))
    Returns per-step (op, hid1, hid2), each with a leading time axis.
    """
    w1, b1, w2, b2, w3, b3 = params
    T, B, inp = xs.shape
    hid1_d = w1.shape[1]
    hid2_d = w2.shape[1]
    op_d = w3.shape[1]

    bb = B if batch_block is None else batch_block
    assert B % bb == 0 and (bb % 8 == 0 or bb == B), "batch block must tile B"
    nb = B // bb

    h1p = _round_up(hid1_d, LANE)
    h2p = _round_up(hid2_d, LANE)
    opp = _round_up(op_d, LANE)

    # Wrapper-side layout prep (done once, outside the kernel): split the merged
    # concat weights at the concat boundary and zero-pad all feature dims to a
    # full 128-lane vreg so every in-kernel store is lane-dense.
    w1x = _pad_to(w1[:inp, :], (inp, h1p))
    w1h = _pad_to(w1[inp:, :], (h1p, h1p))
    b1p = _pad_to(b1, (1, h1p))
    w2h1 = _pad_to(w2[:hid1_d, :], (h1p, h2p))
    w2h2 = _pad_to(w2[hid1_d:, :], (h2p, h2p))
    b2p = _pad_to(b2, (1, h2p))
    w3p = _pad_to(w3, (h2p, opp))
    b3p = _pad_to(b3, (1, opp), fill=NEG_PAD)

    h1_0 = _pad_to(h1, (B, h1p))
    h2_0 = _pad_to(h2, (B, h2p))

    const = lambda b, t: (0, 0)     # weights/biases: resident across the grid
    per_b = lambda b, t: (b, 0)     # initial hidden state: per batch block
    per_bt = lambda b, t: (t, b, 0)  # per-step inputs/outputs

    out_shapes = (
        jax.ShapeDtypeStruct((T, B, opp), jnp.float32),
        jax.ShapeDtypeStruct((T, B, h1p), jnp.float32),
        jax.ShapeDtypeStruct((T, B, h2p), jnp.float32),
    )

    op_seq, hid1_seq, hid2_seq = pl.pallas_call(
        _rnn_seq_kernel,
        out_shape=out_shapes,
        grid=(nb, T),
        in_specs=[
            pl.BlockSpec((1, bb, inp), per_bt),   # x_t
            pl.BlockSpec((bb, h1p), per_b),       # h1_0
            pl.BlockSpec((bb, h2p), per_b),       # h2_0
            pl.BlockSpec((inp, h1p), const),      # w1x
            pl.BlockSpec((h1p, h1p), const),      # w1h
            pl.BlockSpec((1, h1p), const),        # b1
            pl.BlockSpec((h1p, h2p), const),      # w2h1
            pl.BlockSpec((h2p, h2p), const),      # w2h2
            pl.BlockSpec((1, h2p), const),        # b2
            pl.BlockSpec((h2p, opp), const),      # w3
            pl.BlockSpec((1, opp), const),        # b3
        ],
        out_specs=[
            pl.BlockSpec((1, bb, opp), per_bt),
            pl.BlockSpec((1, bb, h1p), per_bt),
            pl.BlockSpec((1, bb, h2p), per_bt),
        ],
        scratch_shapes=[
            pltpu.VMEM((bb, h1p), jnp.float32),   # h1 carry
            pltpu.VMEM((bb, h2p), jnp.float32),   # h2 carry
        ],
        compiler_params=pltpu.CompilerParams(
            dimension_semantics=("parallel", "arbitrary")),
    )(xs, h1_0, h2_0, w1x, w1h, b1p, w2h1, w2h2, b2p, w3p, b3p)

    return (op_seq[:, :, :op_d],
            hid1_seq[:, :, :hid1_d],
            hid2_seq[:, :, :hid2_d])


def rnn_forward(x, h1, h2, params):
    """Single-step forward matching the torch module: returns (op, hid1, hid2)."""
    op, h1n, h2n = rnn_forward_sequence(x[None], h1, h2, params)
    return op[0], h1n[0], h2n[0]


def init_params(key, inp, hid1, hid2, op):
    """nn.Linear default init (uniform +/- 1/sqrt(fan_in)); weights transposed to
    (in_features, out_features) and kept merged at the concat boundary."""
    ks = jax.random.split(key, 6)

    def lin(kw, kb, fan_in, fan_out):
        bound = 1.0 / jnp.sqrt(jnp.float32(fan_in))
        w = jax.random.uniform(kw, (fan_in, fan_out), jnp.float32, -bound, bound)
        b = jax.random.uniform(kb, (1, fan_out), jnp.float32, -bound, bound)
        return w, b

    w1, b1 = lin(ks[0], ks[1], inp + hid1, hid1)
    w2, b2 = lin(ks[2], ks[3], hid1 + hid2, hid2)
    w3, b3 = lin(ks[4], ks[5], hid2, op)
    return (w1, b1, w2, b2, w3, b3)


def rnn_reference_sequence(xs, h1, h2, params):
    """Pure-JAX per-step reference (mirrors the torch forward applied T times)."""
    w1, b1, w2, b2, w3, b3 = params
    hi = jax.lax.Precision.HIGHEST
    ops, h1s, h2s = [], [], []
    for t in range(xs.shape[0]):
        h1 = jnp.dot(jnp.concatenate([xs[t], h1], axis=1), w1, precision=hi) + b1
        h2 = jnp.dot(jnp.concatenate([h1, h2], axis=1), w2, precision=hi) + b2
        logits = jnp.dot(h2, w3, precision=hi) + b3
        ops.append(jax.nn.log_softmax(logits, axis=1))
        h1s.append(h1)
        h2s.append(h2)
    return jnp.stack(ops), jnp.stack(h1s), jnp.stack(h2s)


if __name__ == "__main__":
    T, B, INP, HID1, HID2, OP = 8, 8, 16, 32, 32, 8

    key = jax.random.PRNGKey(0)
    k_x, k_h1, k_h2, k_p = jax.random.split(key, 4)

    xs = jax.random.normal(k_x, (T, B, INP), jnp.float32)
    h1 = jax.random.normal(k_h1, (B, HID1), jnp.float32)
    h2 = jax.random.normal(k_h2, (B, HID2), jnp.float32)
    params = init_params(k_p, INP, HID1, HID2, OP)

    # Fused-sequence kernel (one pallas_call for all T steps).
    op_seq, h1_seq, h2_seq = rnn_forward_sequence(xs, h1, h2, params, batch_block=B)
    jax.block_until_ready((op_seq, h1_seq, h2_seq))

    op_ref, h1_ref, h2_ref = rnn_reference_sequence(xs, h1, h2, params)
    assert jnp.allclose(op_seq, op_ref, atol=1e-3, rtol=1e-3)
    assert jnp.allclose(h1_seq, h1_ref, atol=1e-3, rtol=1e-3)
    assert jnp.allclose(h2_seq, h2_ref, atol=1e-3, rtol=1e-3)

    # Single-step call matching the original module interface.
    op1, nh1, nh2 = rnn_forward(xs[0], h1, h2, params)
    jax.block_until_ready((op1, nh1, nh2))
    assert jnp.allclose(op1, op_ref[0], atol=1e-3, rtol=1e-3)
    assert jnp.allclose(nh1, h1_ref[0], atol=1e-3, rtol=1e-3)
    assert jnp.allclose(nh2, h2_ref[0], atol=1e-3, rtol=1e-3)

    print("KERNEL_OK")
</pallas_src>

<mosaic_0001>
module attributes {stable_mosaic.version = 11 : i64} {
  func.func @_rnn_seq_kernel(%arg0: i32, %arg1: i32, %arg2: memref<1x8x16xf32, #tpu.memory_space<vmem>>, %arg3: memref<8x128xf32, #tpu.memory_space<vmem>>, %arg4: memref<8x128xf32, #tpu.memory_space<vmem>>, %arg5: memref<16x128xf32, #tpu.memory_space<vmem>>, %arg6: memref<128x128xf32, #tpu.memory_space<vmem>>, %arg7: memref<1x128xf32, #tpu.memory_space<vmem>>, %arg8: memref<128x128xf32, #tpu.memory_space<vmem>>, %arg9: memref<128x128xf32, #tpu.memory_space<vmem>>, %arg10: memref<1x128xf32, #tpu.memory_space<vmem>>, %arg11: memref<128x128xf32, #tpu.memory_space<vmem>>, %arg12: memref<1x128xf32, #tpu.memory_space<vmem>>, %arg13: memref<1x8x128xf32, #tpu.memory_space<vmem>>, %arg14: memref<1x8x128xf32, #tpu.memory_space<vmem>>, %arg15: memref<1x8x128xf32, #tpu.memory_space<vmem>>, %arg16: memref<8x128xf32, #tpu.memory_space<vmem>>, %arg17: memref<8x128xf32, #tpu.memory_space<vmem>>) attributes {dimension_semantics = [#tpu.dimension_semantics<parallel>, #tpu.dimension_semantics<arbitrary>], iteration_bounds = array<i64: 1, 8>, scalar_prefetch = 0 : i64, scratch_operands = 2 : i64, tpu.core_type = #tpu.core_type<tc>, window_params = [{transform_indices = @transform_0, window_bounds = array<i64: 1, 8, 16>}, {transform_indices = @transform_1, window_bounds = array<i64: 8, 128>}, {transform_indices = @transform_2, window_bounds = array<i64: 8, 128>}, {pipeline_mode = #tpu.pipeline_mode<synchronous>, transform_indices = @transform_3, window_bounds = array<i64: 16, 128>}, {pipeline_mode = #tpu.pipeline_mode<synchronous>, transform_indices = @transform_4, window_bounds = array<i64: 128, 128>}, {pipeline_mode = #tpu.pipeline_mode<synchronous>, transform_indices = @transform_5, window_bounds = array<i64: 1, 128>}, {pipeline_mode = #tpu.pipeline_mode<synchronous>, transform_indices = @transform_6, window_bounds = array<i64: 128, 128>}, {pipeline_mode = #tpu.pipeline_mode<synchronous>, transform_indices = @transform_7, window_bounds = array<i64: 128, 128>}, {pipeline_mode = #tpu.pipeline_mode<synchronous>, transform_indices = @transform_8, window_bounds = array<i64: 1, 128>}, {pipeline_mode = #tpu.pipeline_mode<synchronous>, transform_indices = @transform_9, window_bounds = array<i64: 128, 128>}, {pipeline_mode = #tpu.pipeline_mode<synchronous>, transform_indices = @transform_10, window_bounds = array<i64: 1, 128>}, {transform_indices = @transform_11, window_bounds = array<i64: 1, 8, 128>}, {transform_indices = @transform_12, window_bounds = array<i64: 1, 8, 128>}, {transform_indices = @transform_13, window_bounds = array<i64: 1, 8, 128>}]} {
    %c0_i32 = arith.constant 0 : i32
    %0 = arith.cmpi eq, %arg1, %c0_i32 : i32
    %1 = arith.extui %0 : i1 to i32
    %c0_i32_0 = arith.constant 0 : i32
    %2 = arith.cmpi ne, %1, %c0_i32_0 : i32
    scf.if %2 {
      %c0_42 = arith.constant 0 : index
      %c0_43 = arith.constant 0 : index
      %49 = vector.load %arg3[%c0_42, %c0_43] : memref<8x128xf32, #tpu.memory_space<vmem>>, vector<8x128xf32>
      %c0_44 = arith.constant 0 : index
      %c0_45 = arith.constant 0 : index
      %50 = vector.load %arg16[%c0_44, %c0_45] : memref<8x128xf32, #tpu.memory_space<vmem>>, vector<8x128xf32>
      tpu.vector_store %arg16[%c0_44, %c0_45], %49 {strides = array<i32>} : memref<8x128xf32, #tpu.memory_space<vmem>>, vector<8x128xf32>,
      %c0_46 = arith.constant 0 : index
      %c0_47 = arith.constant 0 : index
      %51 = vector.load %arg4[%c0_46, %c0_47] : memref<8x128xf32, #tpu.memory_space<vmem>>, vector<8x128xf32>
      %c0_48 = arith.constant 0 : index
      %c0_49 = arith.constant 0 : index
      %52 = vector.load %arg17[%c0_48, %c0_49] : memref<8x128xf32, #tpu.memory_space<vmem>>, vector<8x128xf32>
      tpu.vector_store %arg17[%c0_48, %c0_49], %51 {strides = array<i32>} : memref<8x128xf32, #tpu.memory_space<vmem>>, vector<8x128xf32>,
    } else {
    }
    %c0 = arith.constant 0 : index
    %c0_1 = arith.constant 0 : index
    %c0_2 = arith.constant 0 : index
    %3 = vector.load %arg2[%c0, %c0_1, %c0_2] : memref<1x8x16xf32, #tpu.memory_space<vmem>>, vector<1x8x16xf32>
    %4 = vector.shape_cast %3 : vector<1x8x16xf32> to vector<8x16xf32>
    %c0_3 = arith.constant 0 : index
    %c0_4 = arith.constant 0 : index
    %5 = vector.load %arg16[%c0_3, %c0_4] : memref<8x128xf32, #tpu.memory_space<vmem>>, vector<8x128xf32>
    %c0_5 = arith.constant 0 : index
    %c0_6 = arith.constant 0 : index
    %6 = vector.load %arg17[%c0_5, %c0_6] : memref<8x128xf32, #tpu.memory_space<vmem>>, vector<8x128xf32>
    %c0_7 = arith.constant 0 : index
    %c0_8 = arith.constant 0 : index
    %7 = vector.load %arg5[%c0_7, %c0_8] : memref<16x128xf32, #tpu.memory_space<vmem>>, vector<16x128xf32>
    %cst = arith.constant dense<0.000000e+00> : vector<8x128xf32>
    %8 = tpu.matmul %4, %7, %cst {dimension_numbers = #tpu.dot_dimension_numbers<[1], [0], [0], [1], [0, 0, 1, 1], [], []>} : vector<8x16xf32>, vector<16x128xf32>, vector<8x128xf32> -> vector<8x128xf32>
    %c0_9 = arith.constant 0 : index
    %c0_10 = arith.constant 0 : index
    %9 = vector.load %arg6[%c0_9, %c0_10] : memref<128x128xf32, #tpu.memory_space<vmem>>, vector<128x128xf32>
    %cst_11 = arith.constant dense<0.000000e+00> : vector<8x128xf32>
    %10 = tpu.matmul %5, %9, %cst_11 {dimension_numbers = #tpu.dot_dimension_numbers<[1], [0], [0], [1], [0, 0, 1, 1], [], []>} : vector<8x128xf32>, vector<128x128xf32>, vector<8x128xf32> -> vector<8x128xf32>
    %11 = arith.addf %8, %10 : vector<8x128xf32>
    %c0_12 = arith.constant 0 : index
    %c0_13 = arith.constant 0 : index
    %12 = vector.load %arg7[%c0_12, %c0_13] : memref<1x128xf32, #tpu.memory_space<vmem>>, vector<1x128xf32>
    %13 = vector.broadcast %12 : vector<1x128xf32> to vector<8x128xf32>
    %14 = arith.addf %11, %13 : vector<8x128xf32>
    %c0_14 = arith.constant 0 : index
    %c0_15 = arith.constant 0 : index
    %15 = vector.load %arg8[%c0_14, %c0_15] : memref<128x128xf32, #tpu.memory_space<vmem>>, vector<128x128xf32>
    %cst_16 = arith.constant dense<0.000000e+00> : vector<8x128xf32>
    %16 = tpu.matmul %14, %15, %cst_16 {dimension_numbers = #tpu.dot_dimension_numbers<[1], [0], [0], [1], [0, 0, 1, 1], [], []>} : vector<8x128xf32>, vector<128x128xf32>, vector<8x128xf32> -> vector<8x128xf32>
    %c0_17 = arith.constant 0 : index
    %c0_18 = arith.constant 0 : index
    %17 = vector.load %arg9[%c0_17, %c0_18] : memref<128x128xf32, #tpu.memory_space<vmem>>, vector<128x128xf32>
    %cst_19 = arith.constant dense<0.000000e+00> : vector<8x128xf32>
    %18 = tpu.matmul %6, %17, %cst_19 {dimension_numbers = #tpu.dot_dimension_numbers<[1], [0], [0], [1], [0, 0, 1, 1], [], []>} : vector<8x128xf32>, vector<128x128xf32>, vector<8x128xf32> -> vector<8x128xf32>
    %19 = arith.addf %16, %18 : vector<8x128xf32>
    %c0_20 = arith.constant 0 : index
    %c0_21 = arith.constant 0 : index
    %20 = vector.load %arg10[%c0_20, %c0_21] : memref<1x128xf32, #tpu.memory_space<vmem>>, vector<1x128xf32>
    %21 = vector.broadcast %20 : vector<1x128xf32> to vector<8x128xf32>
    %22 = arith.addf %19, %21 : vector<8x128xf32>
    %c0_22 = arith.constant 0 : index
    %c0_23 = arith.constant 0 : index
    %23 = vector.load %arg11[%c0_22, %c0_23] : memref<128x128xf32, #tpu.memory_space<vmem>>, vector<128x128xf32>
    %cst_24 = arith.constant dense<0.000000e+00> : vector<8x128xf32>
    %24 = tpu.matmul %22, %23, %cst_24 {dimension_numbers = #tpu.dot_dimension_numbers<[1], [0], [0], [1], [0, 0, 1, 1], [], []>} : vector<8x128xf32>, vector<128x128xf32>, vector<8x128xf32> -> vector<8x128xf32>
    %c0_25 = arith.constant 0 : index
    %c0_26 = arith.constant 0 : index
    %25 = vector.load %arg12[%c0_25, %c0_26] : memref<1x128xf32, #tpu.memory_space<vmem>>, vector<1x128xf32>
    %26 = vector.broadcast %25 : vector<1x128xf32> to vector<8x128xf32>
    %27 = arith.addf %24, %26 : vector<8x128xf32>
    %cst_27 = arith.constant dense<0xFF800000> : vector<8xf32>
    %28 = vector.multi_reduction <maximumf>, %27, %cst_27 [1] : vector<8x128xf32> to vector<8xf32>
    %29 = vector.shape_cast %28 : vector<8xf32> to vector<8x1xf32>
    %30 = vector.broadcast %29 : vector<8x1xf32> to vector<8x128xf32>
    %31 = arith.subf %27, %30 : vector<8x128xf32>
    %32 = math.exp %31 : vector<8x128xf32>
    %cst_28 = arith.constant dense<0.000000e+00> : vector<8xf32>
    %33 = vector.multi_reduction <add>, %32, %cst_28 [1] : vector<8x128xf32> to vector<8xf32>
    %34 = vector.shape_cast %33 : vector<8xf32> to vector<8x1xf32>
    %35 = math.log %34 : vector<8x1xf32>
    %36 = vector.broadcast %35 : vector<8x1xf32> to vector<8x128xf32>
    %37 = arith.subf %31, %36 : vector<8x128xf32>
    %c0_29 = arith.constant 0 : index
    %c0_30 = arith.constant 0 : index
    %c0_31 = arith.constant 0 : index
    %38 = vector.load %arg13[%c0_29, %c0_30, %c0_31] : memref<1x8x128xf32, #tpu.memory_space<vmem>>, vector<1x8x128xf32>
    %39 = vector.shape_cast %38 : vector<1x8x128xf32> to vector<8x128xf32>
    %40 = vector.shape_cast %37 : vector<8x128xf32> to vector<1x8x128xf32>
    tpu.vector_store %arg13[%c0_29, %c0_30, %c0_31], %40 {strides = array<i32>} : memref<1x8x128xf32, #tpu.memory_space<vmem>>, vector<1x8x128xf32>,
    %c0_32 = arith.constant 0 : index
    %c0_33 = arith.constant 0 : index
    %c0_34 = arith.constant 0 : index
    %41 = vector.load %arg14[%c0_32, %c0_33, %c0_34] : memref<1x8x128xf32, #tpu.memory_space<vmem>>, vector<1x8x128xf32>
    %42 = vector.shape_cast %41 : vector<1x8x128xf32> to vector<8x128xf32>
    %43 = vector.shape_cast %14 : vector<8x128xf32> to vector<1x8x128xf32>
    tpu.vector_store %arg14[%c0_32, %c0_33, %c0_34], %43 {strides = array<i32>} : memref<1x8x128xf32, #tpu.memory_space<vmem>>, vector<1x8x128xf32>,
    %c0_35 = arith.constant 0 : index
    %c0_36 = arith.constant 0 : index
    %c0_37 = arith.constant 0 : index
    %44 = vector.load %arg15[%c0_35, %c0_36, %c0_37] : memref<1x8x128xf32, #tpu.memory_space<vmem>>, vector<1x8x128xf32>
    %45 = vector.shape_cast %44 : vector<1x8x128xf32> to vector<8x128xf32>
    %46 = vector.shape_cast %22 : vector<8x128xf32> to vector<1x8x128xf32>
    tpu.vector_store %arg15[%c0_35, %c0_36, %c0_37], %46 {strides = array<i32>} : memref<1x8x128xf32, #tpu.memory_space<vmem>>, vector<1x8x128xf32>,
    %c0_38 = arith.constant 0 : index
    %c0_39 = arith.constant 0 : index
    %47 = vector.load %arg16[%c0_38, %c0_39] : memref<8x128xf32, #tpu.memory_space<vmem>>, vector<8x128xf32>
    tpu.vector_store %arg16[%c0_38, %c0_39], %14 {strides = array<i32>} : memref<8x128xf32, #tpu.memory_space<vmem>>, vector<8x128xf32>,
    %c0_40 = arith.constant 0 : index
    %c0_41 = arith.constant 0 : index
    %48 = vector.load %arg17[%c0_40, %c0_41] : memref<8x128xf32, #tpu.memory_space<vmem>>, vector<8x128xf32>
    tpu.vector_store %arg17[%c0_40, %c0_41], %22 {strides = array<i32>} : memref<8x128xf32, #tpu.memory_space<vmem>>, vector<8x128xf32>,
    return
  }
  func.func @transform_0(%arg0: i32, %arg1: i32) -> (i32, i32, i32) {
    %c0_i32 = arith.constant 0 : i32
    %c0_i32_0 = arith.constant 0 : i32
    return %arg1, %arg0, %c0_i32 : i32, i32, i32
  }
  func.func @transform_1(%arg0: i32, %arg1: i32) -> (i32, i32) {
    %c0_i32 = arith.constant 0 : i32
    %c0_i32_0 = arith.constant 0 : i32
    return %arg0, %c0_i32 : i32, i32
  }
  func.func @transform_2(%arg0: i32, %arg1: i32) -> (i32, i32) {
    %c0_i32 = arith.constant 0 : i32
    %c0_i32_0 = arith.constant 0 : i32
    return %arg0, %c0_i32 : i32, i32
  }
  func.func @transform_3(%arg0: i32, %arg1: i32) -> (i32, i32) {
    %c0_i32 = arith.constant 0 : i32
    %c0_i32_0 = arith.constant 0 : i32
    %c0_i32_1 = arith.constant 0 : i32
    return %c0_i32, %c0_i32_0 : i32, i32
  }
  func.func @transform_4(%arg0: i32, %arg1: i32) -> (i32, i32) {
    %c0_i32 = arith.constant 0 : i32
    %c0_i32_0 = arith.constant 0 : i32
    %c0_i32_1 = arith.constant 0 : i32
    return %c0_i32, %c0_i32_0 : i32, i32
  }
  func.func @transform_5(%arg0: i32, %arg1: i32) -> (i32, i32) {
    %c0_i32 = arith.constant 0 : i32
    %c0_i32_0 = arith.constant 0 : i32
    %c0_i32_1 = arith.constant 0 : i32
    return %c0_i32, %c0_i32_0 : i32, i32
  }
  func.func @transform_6(%arg0: i32, %arg1: i32) -> (i32, i32) {
    %c0_i32 = arith.constant 0 : i32
    %c0_i32_0 = arith.constant 0 : i32
    %c0_i32_1 = arith.constant 0 : i32
    return %c0_i32, %c0_i32_0 : i32, i32
  }
  func.func @transform_7(%arg0: i32, %arg1: i32) -> (i32, i32) {
    %c0_i32 = arith.constant 0 : i32
    %c0_i32_0 = arith.constant 0 : i32
    %c0_i32_1 = arith.constant 0 : i32
    return %c0_i32, %c0_i32_0 : i32, i32
  }
  func.func @transform_8(%arg0: i32, %arg1: i32) -> (i32, i32) {
    %c0_i32 = arith.constant 0 : i32
    %c0_i32_0 = arith.constant 0 : i32
    %c0_i32_1 = arith.constant 0 : i32
    return %c0_i32, %c0_i32_0 : i32, i32
  }
  func.func @transform_9(%arg0: i32, %arg1: i32) -> (i32, i32) {
    %c0_i32 = arith.constant 0 : i32
    %c0_i32_0 = arith.constant 0 : i32
    %c0_i32_1 = arith.constant 0 : i32
    return %c0_i32, %c0_i32_0 : i32, i32
  }
  func.func @transform_10(%arg0: i32, %arg1: i32) -> (i32, i32) {
    %c0_i32 = arith.constant 0 : i32
    %c0_i32_0 = arith.constant 0 : i32
    %c0_i32_1 = arith.constant 0 : i32
    return %c0_i32, %c0_i32_0 : i32, i32
  }
  func.func @transform_11(%arg0: i32, %arg1: i32) -> (i32, i32, i32) {
    %c0_i32 = arith.constant 0 : i32
    %c0_i32_0 = arith.constant 0 : i32
    return %arg1, %arg0, %c0_i32 : i32, i32, i32
  }
  func.func @transform_12(%arg0: i32, %arg1: i32) -> (i32, i32, i32) {
    %c0_i32 = arith.constant 0 : i32
    %c0_i32_0 = arith.constant 0 : i32
    return %arg1, %arg0, %c0_i32 : i32, i32, i32
  }
  func.func @transform_13(%arg0: i32, %arg1: i32) -> (i32, i32, i32) {
    %c0_i32 = arith.constant 0 : i32
    %c0_i32_0 = arith.constant 0 : i32
    return %arg1, %arg0, %c0_i32 : i32, i32, i32
  }
}

</mosaic_0001>

<bundles_post_ra>
// kernel: tpu_custom_call.1
= control target key start
LH: loop header
LB: loop body
LE: loop exit
PB: predicated region body
PF: predicated region fallthrough
CT: control target
= control target key end

     0   :  { %s2816_s0 = inlined_call_operand.hbm [shape: f32[8,8,16], index: 0, kind: input, shape index: {}]   ;;  %s2817_s1 = inlined_call_operand.hbm [shape: f32[8,128], index: 1, kind: input, shape index: {}]   ;;  %s2818_s2 = inlined_call_operand.hbm [shape: f32[8,128], index: 2, kind: input, shape index: {}]   ;;  %s2819_s3 = inlined_call_operand.hbm [shape: f32[16,128], index: 3, kind: input, shape index: {}]   ;;  %s2820_s4 = inlined_call_operand.hbm [shape: f32[128,128], index: 4, kind: input, shape index: {}]   ;;  %s2821_s5 = inlined_call_operand.vmem [shape: f32[1,128], index: 5, kind: input, shape index: {}]   ;;  %s2822_s6 = inlined_call_operand.hbm [shape: f32[128,128], index: 6, kind: input, shape index: {}]   ;;  %s2823_s7 = inlined_call_operand.hbm [shape: f32[128,128], index: 7, kind: input, shape index: {}]   ;;  %s2824_s8 = inlined_call_operand.vmem [shape: f32[1,128], index: 8, kind: input, shape index: {}]   ;;  %s2825_s9 = inlined_call_operand.hbm [shape: f32[128,128], index: 9, kind: input, shape index: {}]   ;;  %s2826_s10 = inlined_call_operand.vmem [shape: f32[1,128], index: 10, kind: input, shape index: {}]   ;;  %s2827_s11 = inlined_call_operand.hbm [shape: f32[8,8,128], index: 11, kind: output, shape index: {0}]   ;;  %s2828_s12 = inlined_call_operand.hbm [shape: f32[8,8,128], index: 12, kind: output, shape index: {1}]   ;;  %s2829_s13 = inlined_call_operand.hbm [shape: f32[8,8,128], index: 13, kind: output, shape index: {2}]  }
   0x1   :  { %2837 = sst [smem:[#allocation29_spill]] %s2816_s0 }
   0x2   :  { %2838 = sst [smem:[#allocation30_spill]] %s2817_s1 }
   0x3   :  { %2839 = sst [smem:[#allocation31_spill]] %s2819_s3 }
   0x4   :  { %2840 = sst [smem:[#allocation32_spill]] %s2821_s5 }
   0x5   :  { %2841 = sst [smem:[#allocation33_spill]] %s2824_s8 }
   0x6   :  { %2842 = sst [smem:[#allocation34_spill]] %s2826_s10 }
   0x7   :  { %2843 = sst [smem:[#allocation35_spill]] %s2827_s11 }
   0x8   :  { %2844 = sst [smem:[#allocation36_spill]] %s2828_s12 }
   0x9   :  { %2845 = sst [smem:[#allocation37_spill]] %s2829_s13 }
   0xa   :  { %19 = vsyncpa [#allocation5], 0 }
   0xb   :  { %21 = vsyncpa [#allocation5 + $0x1], 0 }
   0xc   :  { %22 = vsyncpa [#allocation8], 0 }
   0xd   :  { %23 = vsyncpa [#allocation11], 0 }
   0xe   :  { %24 = vsyncpa [#allocation14], 0 }
   0xf   :  { %25 = vsyncpa [#allocation17], 0 }
  0x10   :  { %26 = vsyncpa [#allocation6], 0 }
  0x11   :  { %28 = vsyncpa [#allocation6 + $0x1], 0 }
  0x12   :  { %29 = vsyncpa [#allocation20], 0 }
  0x13   :  { %31 = vsyncpa [#allocation20 + $0x1], 0  ;;  %s2322_s25 = smov 0   ;;  %s2324_s26 = smov 0  }
  0x14   :  { %s2326_s27 = smov 0   ;;  %s2328_s28 = smov 0  }
  0x15   :  { %s2330_s29 = smov 0   ;;  %s2332_s30 = smov 0  }
  0x16 LB: > { %s2353_s14 = sadd.s32 4294967295, %s2234_s30   ;;  %p1345_p0 = scmp.ge.s32.totalorder %s2234_s30, 1  ;;  %s2234_s30 = sphi %s2332_s30, %s37_s30   ;;  %s2230_s29 = sphi %s2330_s29, %s2882_s29   ;;  %s2226_s28 = sphi %s2328_s28, %s2881_s28   ;;  %s2222_s27 = sphi %s2326_s27, %s2880_s27   ;;  %s2218_s26 = sphi %s2324_s26, %s2879_s26   ;;  %s2214_s25 = sphi %s2322_s25, %s2878_s25  }
  0x17   : > { %p2833_p1 = scmp.eq.s32.totalorder %s2353_s14, 0  ;;  %p386_p2 = scmp.lt.s32.totalorder %s2234_s30, 9 }
  0x18   : > { %s2236_s16 = smov [#allocation7]   ;;  %s2237_s18 = smov [#allocation10]  }
  0x19   : > { %p2358_p3 = pnand %p1345_p0, %p386_p2  ;;  %s401_s17 = sshll.u32 %s2236_s16, 4  ;;  %s402_s17 = int_to_ptr.vmem [resolvable:$true] %s401_s17 }
  0x1a   : > { %s424_s19 = sshll.u32 %s2237_s18, 4  ;;  %s2238_s21 = smov [#allocation13]   ;;  %s2370_s19 = int_to_ptr.vmem [resolvable:$true] %s424_s19 }
  0x1b   : > { %s2846_s15 = scalar_select %p2358_p3, 1, 0 }
  0x1c   : > { %p1734_p4 = pneg %p2358_p3  ;;  %s2372_s22 = sshll.u32 %s2238_s21, 4  ;;  %s454_s22 = int_to_ptr.vmem [resolvable:$true] %s2372_s22 }
  0x1d   : > { %s2848_s1 = sld [smem:[#allocation30_spill]] }
  0x1e   : > { %p2366_p5 = pnand %p1734_p4, %p2833_p1 }
  0x20   : > { %p2382_p7 = pneg %p2366_p5 }
  0x23   : > { %s1850_s16 = scalar_lea.hbm %s2848_s1, 128 }
  0x24   : > { %p1851_p6 = scmp.ne.s32.totalorder %s2848_s1, %s1850_s16  ;;  %p1857_p10 = scmp.lt.u32.totalorder %s1850_s16, %s2848_s1 }
  0x26   : > { %p1853_p8 = pnand %p2382_p7, %p1851_p6 }
  0x28   : > { %p1854_p9 = pneg %p1853_p8 }
  0x2a   : > { %p1859_p11 = pnand %p1857_p10, %p1854_p9 }
  0x2c   : > { %1862 = shalt.err (!%p1859_p11)
}
  0x2d   : > { %s1863_s23 = scalar_lea.vmem %s402_s17, 128  ;;  %p1871_p2 = scmp.lt.s32.totalorder %s402_s17, %s402_s17 }
  0x2e   : > { %p1864_p12 = scmp.ne.s32.totalorder %s402_s17, %s1863_s23  ;;  %p1872_p4 = scmp.lt.s32.totalorder %s1863_s23, %s1863_s23 }
  0x30   : > { %p1866_p13 = pnand %p1864_p12, %p2382_p7  ;;  %p1873_p1 = por %p1872_p4, %p1871_p2 }
  0x32   : > { %p1867_p0 = pneg %p1866_p13 }
  0x34   : > { %p1874_p3 = pnand %p1873_p1, %p1867_p0 }
  0x36   : > { %1877 = shalt.err (!%p1874_p3)
}
  0x37   : > { %1737 = dma.hbm_to_vmem [thread:$0]  (!%p2366_p5), %s2848_s1, 128, %s402_s17, [#allocation8]  }
  0x38   : > { %s2850_s3 = sld [smem:[#allocation31_spill]] }
  0x3e   : > { %s1878_s16 = scalar_lea.hbm %s2850_s3, 256 }
  0x3f   : > { %p1879_p6 = scmp.ne.s32.totalorder %s2850_s3, %s1878_s16  ;;  %p1885_p1 = scmp.lt.u32.totalorder %s1878_s16, %s2850_s3 }
  0x41   : > { %p1881_p8 = pnand %p1879_p6, %p2382_p7 }
  0x43   : > { %p1882_p9 = pneg %p1881_p8 }
  0x45   : > { %p1887_p3 = pnand %p1885_p1, %p1882_p9 }
  0x47   : > { %1890 = shalt.err (!%p1887_p3)
}
  0x48   : > { %s1891_s17 = scalar_lea.vmem %s2370_s19, 256  ;;  %p1899_p13 = scmp.lt.s32.totalorder %s2370_s19, %s2370_s19 }
  0x49   : > { %p1892_p10 = scmp.ne.s32.totalorder %s2370_s19, %s1891_s17  ;;  %p1900_p0 = scmp.lt.s32.totalorder %s1891_s17, %s1891_s17 }
  0x4b   : > { %p1894_p11 = pnand %p1892_p10, %p2382_p7  ;;  %p1901_p2 = por %p1900_p0, %p1899_p13 }
  0x4d   : > { %p1895_p12 = pneg %p1894_p11 }
  0x4f   : > { %p1902_p4 = pnand %p1901_p2, %p1895_p12 }
  0x51   : > { %1905 = shalt.err (!%p1902_p4)
}
  0x52   : > { %s2239_s10 = smov 128   ;;  %s2240_s8 = smov 8  }
  0x53   : > { %1743 = dma.hbm_to_vmem [thread:$0]  (!%p2366_p5), %s2850_s3, 256, %s2370_s19, [#allocation11], %s2239_s10, %s2239_s10, %s2240_s8  }
  0x54   : > { %s1906_s16 = scalar_lea.hbm %s2822_s6, 2048 }
  0x55   : > { %p1907_p6 = scmp.ne.s32.totalorder %s2822_s6, %s1906_s16  ;;  %p1913_p1 = scmp.lt.u32.totalorder %s1906_s16, %s2822_s6 }
  0x57   : > { %p1909_p8 = pnand %p1907_p6, %p2382_p7 }
  0x59   : > { %p1910_p9 = pneg %p1909_p8 }
  0x5b   : > { %p1915_p3 = pnand %p1913_p1, %p1910_p9 }
  0x5d   : > { %1918 = shalt.err (!%p1915_p3)
}
  0x5e   : > { %s1919_s11 = scalar_lea.vmem %s454_s22, 2048  ;;  %p1927_p13 = scmp.lt.s32.totalorder %s454_s22, %s454_s22 }
  0x5f   : > { %p1920_p10 = scmp.ne.s32.totalorder %s454_s22, %s1919_s11  ;;  %p1928_p0 = scmp.lt.s32.totalorder %s1919_s11, %s1919_s11 }
  0x61   : > { %p1922_p11 = pnand %p1920_p10, %p2382_p7  ;;  %p1929_p2 = por %p1928_p0, %p1927_p13 }
  0x63   : > { %p1923_p12 = pneg %p1922_p11 }
  0x65   : > { %p1930_p4 = pnand %p1929_p2, %p1923_p12 }
  0x67   : > { %1933 = shalt.err (!%p1930_p4)
}
  0x68   : > { %1749 = dma.hbm_to_vmem [thread:$0]  (!%p2366_p5), %s2822_s6, 2048, %s454_s22, [#allocation14], %s2239_s10, %s2239_s10, %s2240_s8  }
  0x69   : > { %s2241_s13 = smov [#allocation9]   ;;  %s2242_s24 = smov [#allocation12]  }
  0x6a   : > { %s414_s12 = sshll.u32 %s2241_s13, 4  ;;  %s437_s16 = sshll.u32 %s2242_s24, 4  ;;  %s415_s12 = int_to_ptr.vmem [resolvable:$true] %s414_s12  ;;  %s438_s16 = int_to_ptr.vmem [resolvable:$true] %s437_s16 }
  0x6b   : > { %s1934_s17 = scalar_lea.hbm %s2818_s2, 128 }
  0x6c   : > { %p1935_p6 = scmp.ne.s32.totalorder %s2818_s2, %s1934_s17  ;;  %p1941_p1 = scmp.lt.u32.totalorder %s1934_s17, %s2818_s2 }
  0x6e   : > { %p1937_p8 = pnand %p1935_p6, %p2382_p7 }
  0x70   : > { %p1938_p9 = pneg %p1937_p8 }
  0x72   : > { %p1943_p3 = pnand %p1941_p1, %p1938_p9 }
  0x74   : > { %1946 = shalt.err (!%p1943_p3)
}
  0x75   : > { %s1947_s22 = scalar_lea.vmem %s415_s12, 128  ;;  %p1955_p13 = scmp.lt.s32.totalorder %s415_s12, %s415_s12 }
  0x76   : > { %p1948_p10 = scmp.ne.s32.totalorder %s415_s12, %s1947_s22  ;;  %p1956_p0 = scmp.lt.s32.totalorder %s1947_s22, %s1947_s22 }
  0x78   : > { %p1950_p11 = pnand %p1948_p10, %p2382_p7  ;;  %p1957_p2 = por %p1956_p0, %p1955_p13 }
  0x7a   : > { %p1951_p12 = pneg %p1950_p11 }
  0x7c   : > { %p1958_p4 = pnand %p1957_p2, %p1951_p12 }
  0x7e   : > { %1961 = shalt.err (!%p1958_p4)
}
  0x7f   : > { %1740 = dma.hbm_to_vmem [thread:$0]  (!%p2366_p5), %s2818_s2, 128, %s415_s12, [#allocation8]  }
  0x80   : > { %s1962_s24 = scalar_lea.hbm %s2820_s4, 2048 }
  0x81   : > { %p1963_p6 = scmp.ne.s32.totalorder %s2820_s4, %s1962_s24  ;;  %p1969_p1 = scmp.lt.u32.totalorder %s1962_s24, %s2820_s4 }
  0x83   : > { %p1965_p8 = pnand %p1963_p6, %p2382_p7 }
  0x85   : > { %p1966_p9 = pneg %p1965_p8 }
  0x87   : > { %p1971_p3 = pnand %p1969_p1, %p1966_p9 }
  0x89   : > { %1974 = shalt.err (!%p1971_p3)
}
  0x8a   : > { %s1975_s1 = scalar_lea.vmem %s438_s16, 2048  ;;  %p1983_p13 = scmp.lt.s32.totalorder %s438_s16, %s438_s16 }
  0x8b   : > { %p1976_p10 = scmp.ne.s32.totalorder %s438_s16, %s1975_s1  ;;  %p1984_p0 = scmp.lt.s32.totalorder %s1975_s1, %s1975_s1 }
  0x8d   : > { %p1978_p11 = pnand %p1976_p10, %p2382_p7  ;;  %p1985_p2 = por %p1984_p0, %p1983_p13 }
  0x8f   : > { %p1979_p12 = pneg %p1978_p11 }
  0x91   : > { %p1986_p4 = pnand %p1985_p2, %p1979_p12 }
  0x93   : > { %1989 = shalt.err (!%p1986_p4)
}
  0x94   : > { %1746 = dma.hbm_to_vmem [thread:$0]  (!%p2366_p5), %s2820_s4, 2048, %s438_s16, [#allocation11], %s2239_s10, %s2239_s10, %s2240_s8  }
  0x95   : > { %s2243_s3 = smov [#allocation15]   ;;  %s2244_s5 = smov [#allocation16]  }
  0x96   : > { %s466_s19 = sshll.u32 %s2243_s3, 4  ;;  %s482_s13 = sshll.u32 %s2244_s5, 4  ;;  %s467_s19 = int_to_ptr.vmem [resolvable:$true] %s466_s19  ;;  %s483_s13 = int_to_ptr.vmem [resolvable:$true] %s482_s13 }
  0x97   : > { %s1990_s23 = scalar_lea.hbm %s2823_s7, 2048 }
  0x98   : > { %p1991_p6 = scmp.ne.s32.totalorder %s2823_s7, %s1990_s23  ;;  %p1997_p1 = scmp.lt.u32.totalorder %s1990_s23, %s2823_s7 }
  0x9a   : > { %p1993_p8 = pnand %p1991_p6, %p2382_p7 }
  0x9c   : > { %p1994_p9 = pneg %p1993_p8 }
  0x9e   : > { %p1999_p3 = pnand %p1997_p1, %p1994_p9 }
  0xa0   : > { %2002 = shalt.err (!%p1999_p3)
}
  0xa1   : > { %s2003_s16 = scalar_lea.vmem %s467_s19, 2048  ;;  %p2011_p13 = scmp.lt.s32.totalorder %s467_s19, %s467_s19 }
  0xa2   : > { %p2004_p10 = scmp.ne.s32.totalorder %s467_s19, %s2003_s16  ;;  %p2012_p0 = scmp.lt.s32.totalorder %s2003_s16, %s2003_s16 }
  0xa4   : > { %p2006_p11 = pnand %p2004_p10, %p2382_p7  ;;  %p2013_p2 = por %p2012_p0, %p2011_p13 }
  0xa6   : > { %p2007_p12 = pneg %p2006_p11 }
  0xa8   : > { %p2014_p4 = pnand %p2013_p2, %p2007_p12 }
  0xaa   : > { %2017 = shalt.err (!%p2014_p4)
}
  0xab   : > { %1752 = dma.hbm_to_vmem [thread:$0]  (!%p2366_p5), %s2823_s7, 2048, %s467_s19, [#allocation14], %s2239_s10, %s2239_s10, %s2240_s8  }
  0xac   : > { %s2018_s21 = scalar_lea.hbm %s2825_s9, 2048 }
  0xad   : > { %p2019_p6 = scmp.ne.s32.totalorder %s2825_s9, %s2018_s21  ;;  %p2025_p1 = scmp.lt.u32.totalorder %s2018_s21, %s2825_s9 }
  0xaf   : > { %p2021_p8 = pnand %p2019_p6, %p2382_p7 }
  0xb1   : > { %p2022_p9 = pneg %p2021_p8 }
  0xb3   : > { %p2027_p3 = pnand %p2025_p1, %p2022_p9 }
  0xb5   : > { %2030 = shalt.err (!%p2027_p3)
}
  0xb6   : > { %s2031_s12 = scalar_lea.vmem %s483_s13, 2048  ;;  %p2039_p13 = scmp.lt.s32.totalorder %s483_s13, %s483_s13 }
  0xb7   : > { %p2032_p10 = scmp.ne.s32.totalorder %s483_s13, %s2031_s12  ;;  %p2040_p0 = scmp.lt.s32.totalorder %s2031_s12, %s2031_s12 }
  0xb9   : > { %p2034_p11 = pnand %p2032_p10, %p2382_p7  ;;  %p2041_p2 = por %p2040_p0, %p2039_p13 }
  0xbb   : > { %p2035_p12 = pneg %p2034_p11 }
  0xbd   : > { %p2042_p4 = pnand %p2041_p2, %p2035_p12 }
  0xbf   : > { %2045 = shalt.err (!%p2042_p4)
}
  0xc0   : > { %1755 = dma.hbm_to_vmem [thread:$0]  (!%p2366_p5), %s2825_s9, 2048, %s483_s13, [#allocation17], %s2239_s10, %s2239_s10, %s2240_s8  }
  0xc1   : > { %s2835_s20 = sadd.s32 4294967294, %s2234_s30   ;;  %s46_s18 = sadd.s32 1, %s2230_s29 }
  0xc2   : > { %s58_s22 = sadd.s32 1, %s2222_s27  ;;  %p47_p7 = scmp.ge.s32.totalorder %s46_s18, 8 }
  0xc3   : > { %p65_p6 = scmp.ne.s32.totalorder %s2222_s27, %s2218_s26  ;;  %p66_p8 = scmp.eq.s32.totalorder %s2234_s30, 0 }
  0xc4   : > { %p71_p9 = scmp.ne.s32.totalorder %s2218_s26, %s2214_s25  ;;  %s2884_s18 = smov (%p47_p7, %s46_s18), 0 }
  0xc5   : > { %p2537_p1 = por %p66_p8, %p65_p6  ;;  %p2852_p3 = scmp.eq.s32.totalorder %s2353_s14, 0 }
  0xc6   : > { %s53_s8 = ssub.s32 %s2230_s29, %s2884_s18  ;;  %p317_p10 = scmp.eq.s32.totalorder %s2353_s14, 7 }
  0xc7   : > { %p2543_p5 = por %p2852_p3, %p71_p9  ;;  %p56_p11 = scmp.eq.s32.totalorder %s53_s8, 0 }
  0xc8   : > { %p323_p12 = scmp.eq.s32.totalorder %s2835_s20, 7  ;;  %p2552_p13 = por %p317_p10, %p65_p6 }
  0xc9   : > { %p1777_p0 = scmp.lt.s32.totalorder %s2234_s30, 8  ;;  %s499_s21 = sand.u32 1, %s2222_s27  }
  0xca   : > { %s2854_s13 = scalar_select %p2552_p13, 1, 0 }
  0xcb   : > { %s2558_s5 = scalar_select %p56_p11, %s2222_s27, %s58_s22  }
  0xcc   : > { %p2560_p2 = por %p323_p12, %p71_p9  ;;  %s1354_s23 = sshll.u32 %s499_s21, 3 }
  0xcd   : > { %s1355_s17 = sshll.u32 %s2230_s29, 7  ;;  %s2856_s0 = sld [smem:[#allocation29_spill]] }
  0xce   : > { %s2855_s24 = scalar_select %p2560_p2, 1, 0 }
  0xcf   : > { %s503_s19 = scalar_lea.vmem [#allocation4], %s1354_s23  ;;  %p2575_p4 = pnand %p1777_p0, %p2537_p1 }
  0xd0   : > { %s511_s16 = sshll.u32 %s503_s19, 4  ;;  %s500_s8 = scalar_lea.sflag [#allocation5], %s499_s21  ;;  %s2571_s16 = int_to_ptr.vmem [resolvable:$true] %s511_s16 }
  0xd1   : > { %p2048_p6 = pneg %p2575_p4 }
  0xd3   : > { %s2569_s12 = scalar_lea.hbm %s2856_s0, %s1355_s17  ;;  %s2051_s11 = scalar_lea.hbm %s2856_s0, 1024 }
  0xd4   : > { %s2046_s20 = scalar_lea.hbm %s2569_s12, 128  ;;  %p2052_p1 = scmp.lt.u32.totalorder %s2569_s12, %s2856_s0 }
  0xd5   : > { %p2047_p7 = scmp.ne.s32.totalorder %s2569_s12, %s2046_s20  ;;  %p2053_p3 = scmp.lt.u32.totalorder %s2051_s11, %s2046_s20 }
  0xd6   : > { %p2055_p11 = scmp.lt.u32.totalorder %s2046_s20, %s2569_s12 }
  0xd7   : > { %p2049_p8 = pnand %p2048_p6, %p2047_p7  ;;  %p2054_p10 = por %p2053_p3, %p2052_p1 }
  0xd9   : > { %p2050_p9 = pneg %p2049_p8  ;;  %p2056_p12 = por %p2055_p11, %p2054_p10 }
  0xdb   : > { %p2057_p0 = pnand %p2056_p12, %p2050_p9 }
  0xdd   : > { %2060 = shalt.err (!%p2057_p0)
}
  0xde   : > { %s2061_s21 = scalar_lea.vmem %s2571_s16, 128  ;;  %s2245_s19 = smov [#allocation4]  }
  0xdf   : > { %p2062_p7 = scmp.ne.s32.totalorder %s2571_s16, %s2061_s21  ;;  %s2066_s23 = sshll.u32 %s2245_s19, 4  ;;  %s2067_s23 = int_to_ptr.vmem [resolvable:$false] %s2066_s23 }
  0xe0   : > { %s2068_s17 = scalar_lea.vmem %s2067_s23, 256  ;;  %p2069_p13 = scmp.lt.s32.totalorder %s2571_s16, %s2067_s23 }
  0xe1   : > { %p2064_p8 = pnand %p2062_p7, %p2048_p6  ;;  %p2070_p1 = scmp.lt.s32.totalorder %s2068_s17, %s2061_s21 }
  0xe3   : > { %p2065_p2 = pneg %p2064_p8  ;;  %p2071_p3 = por %p2070_p1, %p2069_p13 }
  0xe5   : > { %p2072_p10 = pnand %p2071_p3, %p2065_p2 }
  0xe7   : > { %2075 = shalt.err (!%p2072_p10)
}
  0xe8   : > { %1759 = dma.hbm_to_vmem [thread:$0]  (!%p2575_p4), %s2569_s12, 128, %s2571_s16, %s500_s8  }
  0xe9   : > { %p2858_p9 = scmp.ne.s32.totalorder %s2846_s15, 0 }
  0xea   : > { %s2607_s20 = sand.u32 (!%p2858_p9), 1, %s2218_s26  }
  0xeb   : > { %520 = sbr.rel (%p2858_p9) target bundleno = 1274 (0x4fa), region = 64  ;;  %s2610_s11 = sshll.u32 (!%p2858_p9), %s2607_s20, 3 }
  0xec   : > { %s523_s3 = scalar_lea.sflag (!%p2858_p9), [#allocation5], %s2607_s20  ;;  %s526_s1 = scalar_lea.vmem (!%p2858_p9), [#allocation4], %s2610_s11 }
  0xf2   : > { %2185 = dma.done.wait (%p2543_p5), %s523_s3, 128  }
  0xf3   : > { %2187 = vsyncadd (%p2543_p5), %s523_s3, 4294967168  ;;  %p2859_p13 = scmp.eq.s32.totalorder %s2353_s14, 0 }
  0xf5   : > { %2189 = dma.done.wait (%p2859_p13), [#allocation8], 256   ;;  %p2860_p2 = pmov %p2859_p13 }
  0xf7   : > { %2191 = vsyncadd (%p2860_p2), [#allocation8], 4294967040  ;;  %p2861_p4 = pmov %p2860_p2 }
  0xf8   : > { %p2862_p6 = pmov %p2860_p2 }
  0xf9   : > { %2193 = dma.done.wait (%p2861_p4), [#allocation11], 2304  }
  0xfa   : > { %2195 = vsyncadd (%p2862_p6), [#allocation11], 4294964992  ;;  %p2863_p11 = pmov %p2860_p2 }
  0xfb   : > { %p2864_p12 = pmov %p2860_p2 }
  0xfc   : > { %2197 = dma.done.wait (%p2863_p11), [#allocation14], 4096  }
  0xfd   : > { %2199 = vsyncadd (%p2864_p12), [#allocation14], 4294963200  ;;  %p2865_p5 = pmov %p2860_p2 }
  0xfe   : > { %p2866_p0 = pmov %p2860_p2 }
  0xff   : > { %2201 = dma.done.wait (%p2865_p5), [#allocation17], 2048  }
 0x100   : > { %2203 = vsyncadd (%p2866_p0), [#allocation17], 4294965248  ;;  %s599_s10 = scalar_lea.vmem [#allocation19], %s2610_s11  ;;  %s606_s12 = scalar_lea.vmem [#allocation21], %s2610_s11 }
 0x101   : > { %p1368_p7 = scmp.ne.s32.totalorder %s2226_s28, 0 }
 0x102   : > { %v611_v0 = vld [vmem:[#allocation7] sm:$0xff] (!%p1368_p7)  ;;  %v613_v1 = vld [vmem:[#allocation9] sm:$0xff] (!%p1368_p7) }
 0x103   : > { %610 = sbr.rel (%p1368_p7) target bundleno = 266 (0x10a), region = 100  ;;  %612 = vst [vmem:[#allocation2] sm:$0xff] (!%p1368_p7), %v611_v0  ;;  %614 = vst [vmem:[#allocation3] sm:$0xff] (!%p1368_p7), %v613_v1 }
 0x10a PF: > { %v620_v2 = vld [vmem:[#allocation12] sm:$0xff]  ;;  %v621_v3 = vld [vmem:[#allocation12 + $0x8] sm:$0xff]  ;;  %v622_v4 = vld [vmem:[#allocation12 + $0x10] sm:$0xff]  ;;  %v2246_v5 = vmov 0.0|0.0   ;;  %vm2247_vm0 = vmmov 0   ;;  %v2248_v8 = vmov 0.0  }
 0x10b   : > { %1599 = vmatprep.subr.bf16.mxu0 %v2246_v5  ;;  %v1600_v6 = vpack.c.bf16 %v621_v3, %v620_v2  ;;  %v623_v7 = vld [vmem:[#allocation12 + $0x18] sm:$0xff]  ;;  %1623 = vmatprep.subr.bf16.mxu1 %v2246_v5  ;;  %v624_v10 = vld [vmem:[#allocation12 + $0x20] sm:$0xff]  ;;  %v625_v11 = vld [vmem:[#allocation12 + $0x28] sm:$0xff]  ;;  %vm706_vm1 = vcmask 130048   ;;  %s2867_s8 = sld [smem:[#allocation32_spill]]  ;;  %s2868_s23 = sld [smem:[#allocation33_spill]] }
 0x10c   : > { %1491 = vmatprep.mubr.msk.f32.mxu1 %vm2247_vm0, %v2248_v8  ;;  %1484 = vmatprep.mubr.msk.f32.mxu0 %vm2247_vm0, %v2248_v8  ;;  %v1603_v9 = vpack.c.bf16 %v623_v7, %v622_v4  ;;  %v618_v12 = vld [vmem:[#allocation10] sm:$0xff]  ;;  %v619_v13 = vld [vmem:[#allocation10 + $0x8] sm:$0xff]  ;;  %v804_v15 = vld [vmem:[#allocation15] sm:$0xff]  ;;  %v1606_v16 = vpack.c.bf16 %v625_v11, %v624_v10  ;;  %s1081_s16 = sand.u32 1, %s2353_s14   ;;  %s2701_s22 = sshll.u32 %s2226_s28, 7 }
 0x10d   : > { %1601 = vmatpush3.bf16.msra.mxu0 %v1600_v6  ;;  %v1624_v14 = vpack.c.bf16 %v619_v13, %v618_v12  ;;  %v805_v17 = vld [vmem:[#allocation15 + $0x8] sm:$0xff]  ;;  %v626_v18 = vld [vmem:[#allocation12 + $0x30] sm:$0xff]  ;;  %v627_v19 = vld [vmem:[#allocation12 + $0x38] sm:$0xff]  ;;  %s2870_s19 = sld [smem:[#allocation36_spill]]  ;;  %s1115_s17 = sshll.u32 %s599_s10, 4  ;;  %s1116_s17 = int_to_ptr.vmem [resolvable:$true] %s1115_s17 }
 0x10e   : > { %1602 = vmatprep.subr.bf16.mxu0 %v2246_v5  ;;  %v615_v20 = vld [vmem:[%s526_s1] sm:$0xff]  ;;  %v1627_v21 = vpack.c.bf16 %v805_v17, %v804_v15  ;;  %v1609_v24 = vpack.c.bf16 %v627_v19, %v626_v18  ;;  %v628_v25 = vld [vmem:[#allocation12 + $0x40] sm:$0xff]  ;;  %v629_v26 = vld [vmem:[#allocation12 + $0x48] sm:$0xff]  ;;  %s2869_s1 = sld [smem:[#allocation34_spill]]  ;;  %s2711_s3 = scalar_lea.sflag [#allocation20], %s1081_s16 }
 0x10f   : > { %1625 = vmatpush3.bf16.msra.mxu1 %v1624_v14  ;;  %v806_v22 = vld [vmem:[#allocation15 + $0x10] sm:$0xff]  ;;  %v807_v23 = vld [vmem:[#allocation15 + $0x18] sm:$0xff]  ;;  %v808_v28 = vld [vmem:[#allocation15 + $0x20] sm:$0xff]  ;;  %v1612_v30 = vpack.c.bf16 %v629_v26, %v628_v25  ;;  %p2871_p1 = scmp.ne.s32.totalorder %s2854_s13, 0  ;;  %s2249_s15 = smov [#allocation19]  }
 0x110   : > { %1626 = vmatprep.subr.bf16.mxu1 %v2246_v5  ;;  %v1630_v27 = vpack.c.bf16 %v807_v23, %v806_v22  ;;  %v809_v29 = vld [vmem:[#allocation15 + $0x28] sm:$0xff]  ;;  %v630_v31 = vld [vmem:[#allocation12 + $0x50] sm:$0xff]  ;;  %v631_v32 = vld [vmem:[#allocation12 + $0x58] sm:$0xff]  ;;  %s2080_s14 = sshll.u32 %s2249_s15, 4  ;;  %s2081_s14 = int_to_ptr.vmem [resolvable:$false] %s2080_s14 }
 0x111   : > { %1604 = vmatpush3.bf16.msra.mxu0 %v1603_v9  ;;  %v1633_v33 = vpack.c.bf16 %v809_v29, %v808_v28  ;;  %v810_v34 = vld [vmem:[#allocation15 + $0x30] sm:$0xff]  ;;  %v811_v35 = vld [vmem:[#allocation15 + $0x38] sm:$0xff]  ;;  %v1615_v36 = vpack.c.bf16 %v631_v32, %v630_v31  ;;  %v632_v37 = vld [vmem:[#allocation12 + $0x60] sm:$0xff]  ;;  %s2082_s28 = scalar_lea.vmem %s2081_s14, 256  ;;  %p2083_p9 = scmp.lt.s32.totalorder %s1116_s17, %s2081_s14 }
 0x112   : > { %1605 = vmatprep.subr.bf16.mxu0 %v2246_v5  ;;  %1492 = vmatmul.mubr.msk.f32.vlgmr.msra.gmra.mrb[0].mxu1 %vm706_vm1, %v615_v20  ;;  %v633_v38 = vld [vmem:[#allocation12 + $0x68] sm:$0xff]  ;;  %v1636_v39 = vpack.c.bf16 %v811_v35, %v810_v34  ;;  %v812_v40 = vld [vmem:[#allocation15 + $0x40] sm:$0xff]  ;;  %v634_v43 = vld [vmem:[#allocation12 + $0x70] sm:$0xff] }
 0x113   : > { %1628 = vmatpush3.bf16.msra.mxu1 %v1627_v21  ;;  %1526 = vmatprep.mubr.msk.f32.mxu1 %vm2247_vm0, %v2248_v8  ;;  %v813_v41 = vld [vmem:[#allocation15 + $0x48] sm:$0xff]  ;;  %v1618_v42 = vpack.c.bf16 %v633_v38, %v632_v37  ;;  %v635_v44 = vld [vmem:[#allocation12 + $0x78] sm:$0xff]  ;;  %v814_v46 = vld [vmem:[#allocation15 + $0x50] sm:$0xff] }
 0x114   : > { %1629 = vmatprep.subr.bf16.mxu1 %v2246_v5  ;;  %v1639_v45 = vpack.c.bf16 %v813_v41, %v812_v40  ;;  %v815_v47 = vld [vmem:[#allocation15 + $0x58] sm:$0xff]  ;;  %v1621_v48 = vpack.c.bf16 %v635_v44, %v634_v43  ;;  %v788_v49 = vld [vmem:[#allocation13] sm:$0xff]  ;;  %v789_v50 = vld [vmem:[#allocation13 + $0x8] sm:$0xff] }
 0x115   : > { %1607 = vmatpush3.bf16.msra.mxu0 %v1606_v16  ;;  %v1642_v51 = vpack.c.bf16 %v815_v47, %v814_v46  ;;  %v816_v52 = vld [vmem:[#allocation15 + $0x60] sm:$0xff]  ;;  %v817_v53 = vld [vmem:[#allocation15 + $0x68] sm:$0xff]  ;;  %v1651_v55 = vpack.c.bf16 %v789_v50, %v788_v49  ;;  %v790_v56 = vld [vmem:[#allocation13 + $0x10] sm:$0xff] }
 0x116   : > { %1608 = vmatprep.subr.bf16.mxu0 %v2246_v5  ;;  %v616_v54 = vld [vmem:[#allocation2] sm:$0xff]  ;;  %v791_v57 = vld [vmem:[#allocation13 + $0x18] sm:$0xff]  ;;  %v1645_v58 = vpack.c.bf16 %v817_v53, %v816_v52  ;;  %v793_v61 = vld [vmem:[#allocation13 + $0x28] sm:$0xff] }
 0x117   : > { %1631 = vmatpush3.bf16.msra.mxu1 %v1630_v27  ;;  %v1654_v59 = vpack.c.bf16 %v791_v57, %v790_v56  ;;  %v792_v60 = vld [vmem:[#allocation13 + $0x20] sm:$0xff]  ;;  %v794_v63 = vld [vmem:[#allocation13 + $0x30] sm:$0xff]  ;;  %v795_v0 = vld [vmem:[#allocation13 + $0x38] sm:$0xff] }
 0x118   : > { %1632 = vmatprep.subr.bf16.mxu1 %v2246_v5  ;;  %v1657_v62 = vpack.c.bf16 %v793_v61, %v792_v60  ;;  %v1660_v1 = vpack.c.bf16 %v795_v0, %v794_v63  ;;  %v796_v2 = vld [vmem:[#allocation13 + $0x40] sm:$0xff]  ;;  %v797_v3 = vld [vmem:[#allocation13 + $0x48] sm:$0xff]  ;;  %v798_v6 = vld [vmem:[#allocation13 + $0x50] sm:$0xff] }
 0x119   : > { %1610 = vmatpush3.bf16.msra.mxu0 %v1609_v24  ;;  %v1663_v4 = vpack.c.bf16 %v797_v3, %v796_v2  ;;  %v799_v7 = vld [vmem:[#allocation13 + $0x58] sm:$0xff]  ;;  %v800_v10 = vld [vmem:[#allocation13 + $0x60] sm:$0xff]  ;;  %v801_v11 = vld [vmem:[#allocation13 + $0x68] sm:$0xff] }
 0x11a   : > { %1611 = vmatprep.subr.bf16.mxu0 %v2246_v5  ;;  %v1666_v9 = vpack.c.bf16 %v799_v7, %v798_v6  ;;  %v1669_v12 = vpack.c.bf16 %v801_v11, %v800_v10  ;;  %v818_v13 = vld [vmem:[#allocation15 + $0x70] sm:$0xff]  ;;  %v819_v14 = vld [vmem:[#allocation15 + $0x78] sm:$0xff]  ;;  %v617_v19 = vld [vmem:[#allocation3] sm:$0xff] }
 0x11b   : > { %1634 = vmatpush3.bf16.msra.mxu1 %v1633_v33  ;;  %v1648_v15 = vpack.c.bf16 %v819_v14, %v818_v13  ;;  %v802_v16 = vld [vmem:[#allocation13 + $0x70] sm:$0xff]  ;;  %v803_v17 = vld [vmem:[#allocation13 + $0x78] sm:$0xff]  ;;  %v968_v20 = vld [vmem:[#allocation16] sm:$0xff] }
 0x11c   : > { %1635 = vmatprep.subr.bf16.mxu1 %v2246_v5  ;;  %v1672_v18 = vpack.c.bf16 %v803_v17, %v802_v16  ;;  %v969_v21 = vld [vmem:[#allocation16 + $0x8] sm:$0xff]  ;;  %v970_v22 = vld [vmem:[#allocation16 + $0x10] sm:$0xff]  ;;  %v971_v24 = vld [vmem:[#allocation16 + $0x18] sm:$0xff] }
 0x11d   : > { %1613 = vmatpush3.bf16.msra.mxu0 %v1612_v30  ;;  %v1675_v23 = vpack.c.bf16 %v969_v21, %v968_v20  ;;  %v1678_v25 = vpack.c.bf16 %v971_v24, %v970_v22  ;;  %v972_v26 = vld [vmem:[#allocation16 + $0x20] sm:$0xff]  ;;  %v973_v27 = vld [vmem:[#allocation16 + $0x28] sm:$0xff]  ;;  %v974_v29 = vld [vmem:[#allocation16 + $0x30] sm:$0xff] }
 0x11e   : > { %1614 = vmatprep.subr.bf16.mxu0 %v2246_v5  ;;  %v1681_v28 = vpack.c.bf16 %v973_v27, %v972_v26  ;;  %v975_v30 = vld [vmem:[#allocation16 + $0x38] sm:$0xff]  ;;  %v976_v32 = vld [vmem:[#allocation16 + $0x40] sm:$0xff]  ;;  %v978_v34 = vld [vmem:[#allocation16 + $0x50] sm:$0xff] }
 0x11f   : > { %1637 = vmatpush3.bf16.msra.mxu1 %v1636_v39  ;;  %v1684_v31 = vpack.c.bf16 %v975_v30, %v974_v29  ;;  %v979_v35 = vld [vmem:[#allocation16 + $0x58] sm:$0xff]  ;;  %v980_v37 = vld [vmem:[#allocation16 + $0x60] sm:$0xff]  ;;  %v981_v38 = vld [vmem:[#allocation16 + $0x68] sm:$0xff] }
 0x120   : > { %1638 = vmatprep.subr.bf16.mxu1 %v2246_v5  ;;  %v1693_v39 = vpack.c.bf16 %v981_v38, %v980_v37  ;;  %v1370_v43 = vld [vmem:[%s2867_s8] ss:$0 sm:$0xff]  ;;  %v983_v49 = vld [vmem:[#allocation16 + $0x78] sm:$0xff] }
 0x121   : > { %1616 = vmatpush3.bf16.msra.mxu0 %v1615_v36  ;;  %v1690_v36 = vpack.c.bf16 %v979_v35, %v978_v34  ;;  %v1371_v52 = vld [vmem:[%s2868_s23] ss:$0 sm:$0xff]  ;;  %s2707_s23 = scalar_lea.hbm %s2870_s19, %s2701_s22 }
 0x122   : > { %1617 = vmatprep.subr.bf16.mxu0 %v2246_v5  ;;  %v1372_v56 = vld [vmem:[%s2869_s1] ss:$0 sm:$0xff]  ;;  %s2076_s1 = scalar_lea.vmem %s1116_s17, 128 }
 0x123   : > { %1640 = vmatpush3.bf16.msra.mxu1 %v1639_v45  ;;  %p2077_p8 = scmp.ne.s32.totalorder %s1116_s17, %s2076_s1  ;;  %p2084_p13 = scmp.lt.s32.totalorder %s2082_s28, %s2076_s1 }
 0x124   : > { %1641 = vmatprep.subr.bf16.mxu1 %v2246_v5 }
 0x125   : > { %1619 = vmatpush3.bf16.msra.mxu0 %v1618_v42  ;;  %p2078_p3 = pnand %p2077_p8, %p2871_p1  ;;  %p2085_p2 = por %p2084_p13, %p2083_p9 }
 0x126   : > { %1620 = vmatprep.subr.bf16.mxu0 %v2246_v5 }
 0x127   : > { %1643 = vmatpush3.bf16.msra.mxu1 %v1642_v51  ;;  %p2079_p10 = pneg %p2078_p3 }
 0x128   : > { %1644 = vmatprep.subr.bf16.mxu1 %v2246_v5 }
 0x129   : > { %1622 = vmatpush3.bf16.msra.mxu0 %v1621_v48  ;;  %v982_v48 = vld [vmem:[#allocation16 + $0x70] sm:$0xff]  ;;  %p2086_p4 = pnand %p2085_p2, %p2079_p10 }
 0x12a   : > { %1650 = vmatprep.subr.bf16.mxu0 %v2246_v5 }
 0x12b   : > { %1646 = vmatpush3.bf16.msra.mxu1 %v1645_v58 }
 0x12c   : > { %1485 = vmatmul.mubr.f32.vlgmr.msra.gmra.mrb[0].mxu0 %v616_v54  ;;  %1647 = vmatprep.subr.bf16.mxu1 %v2246_v5 }
 0x12d   : > { %1652 = vmatpush3.bf16.msra.mxu0 %v1651_v55  ;;  %1561 = vmatprep.mubr.msk.f32.mxu0 %vm2247_vm0, %v2248_v8 }
 0x12e   : > { %1653 = vmatprep.subr.bf16.mxu0 %v2246_v5 }
 0x12f   : > { %1649 = vmatpush3.bf16.msra.mxu1 %v1648_v15 }
 0x130   : > { %1674 = vmatprep.subr.bf16.mxu1 %v2246_v5 }
 0x131   : > { %1655 = vmatpush3.bf16.msra.mxu0 %v1654_v59 }
 0x132   : > { %1656 = vmatprep.subr.bf16.mxu0 %v2246_v5  ;;  %1527 = vmatmul.mubr.f32.vlgmr.msra.gmra.mrb[2].mxu1 %v617_v19 }
 0x133   : > { %1596 = vmatprep.mubr.msk.f32.mxu1 %vm2247_vm0, %v2248_v8  ;;  %1676 = vmatpush3.bf16.msra.mxu1 %v1675_v23  ;;  %v977_v8 = vld [vmem:[#allocation16 + $0x48] sm:$0xff] }
 0x134   : > { %1677 = vmatprep.subr.bf16.mxu1 %v2246_v5  ;;  %v1687_v33 = vpack.c.bf16 %v977_v8, %v976_v32 }
 0x135   : > { %1658 = vmatpush3.bf16.msra.mxu0 %v1657_v62 }
 0x136   : > { %1659 = vmatprep.subr.bf16.mxu0 %v2246_v5 }
 0x137   : > { %1679 = vmatpush3.bf16.msra.mxu1 %v1678_v25 }
 0x138   : > { %1680 = vmatprep.subr.bf16.mxu1 %v2246_v5 }
 0x139   : > { %1661 = vmatpush3.bf16.msra.mxu0 %v1660_v1 }
 0x13a   : > { %1662 = vmatprep.subr.bf16.mxu0 %v2246_v5 }
 0x13b   : > { %1682 = vmatpush3.bf16.msra.mxu1 %v1681_v28 }
 0x13c   : > { %1683 = vmatprep.subr.bf16.mxu1 %v2246_v5 }
 0x13d   : > { %1664 = vmatpush3.bf16.msra.mxu0 %v1663_v4 }
 0x13e   : > { %1665 = vmatprep.subr.bf16.mxu0 %v2246_v5 }
 0x13f   : > { %1685 = vmatpush3.bf16.msra.mxu1 %v1684_v31 }
 0x140   : > { %1686 = vmatprep.subr.bf16.mxu1 %v2246_v5 }
 0x141   : > { %1667 = vmatpush3.bf16.msra.mxu0 %v1666_v9 }
 0x142   : > { %1668 = vmatprep.subr.bf16.mxu0 %v2246_v5 }
 0x143   : > { %1688 = vmatpush3.bf16.msra.mxu1 %v1687_v33 }
 0x144   : > { %1689 = vmatprep.subr.bf16.mxu1 %v2246_v5 }
 0x145   : > { %1670 = vmatpush3.bf16.msra.mxu0 %v1669_v12 }
 0x146   : > { %1671 = vmatprep.subr.bf16.mxu0 %v2246_v5 }
 0x147   : > { %1691 = vmatpush3.bf16.msra.mxu1 %v1690_v36 }
 0x148   : > { %1692 = vmatprep.subr.bf16.mxu1 %v2246_v5 }
 0x149   : > { %1673 = vmatpush3.bf16.msra.mxu0 %v1672_v18 }
 0x14b   : > { %1694 = vmatpush3.bf16.msra.mxu1 %v1693_v39 }
 0x14c   : > { %1695 = vmatprep.subr.bf16.mxu1 %v2246_v5  ;;  %v1696_v5 = vpack.c.bf16 %v983_v49, %v982_v48 }
 0x14f   : > { %1697 = vmatpush3.bf16.msra.mxu1 %v1696_v5 }
 0x1e5   : > { %v776_v40 = vpop.f32.mrb[0].mxu1 }
 0x1e6   : > { %v1493_v41 = vpop.f32.mrb[1].mxu1 }
 0x1ff   : > { %v702_v42 = vpop.f32.mrb[0].mxu0 }
 0x200   : > { %v777_v44 = vadd.f32 %v776_v40, %v702_v42  ;;  %v1486_v45 = vpop.f32.mrb[1].mxu0 }
 0x202   : > { %v787_v46 = vadd.f32 %v1370_v43, %v777_v44 }
 0x204   : > { %1074 = vst [vmem:[#allocation2] sm:$0xff] %v787_v46  ;;  %1072 = vst [vmem:[%s599_s10] sm:$0xff] %v787_v46  ;;  %1562 = vmatmul.mubr.f32.vlgmr.msra.gmra.mrb[2].mxu0 %v787_v46 }
 0x205   : > { %v886_v47 = vpop.f32.mrb[2].mxu1 }
 0x206   : > { %v1528_v50 = vpop.f32.mrb[3].mxu1 }
 0x2d7   : > { %v956_v51 = vpop.f32.mrb[2].mxu0 }
 0x2d8   : > { %v957_v53 = vadd.f32 %v956_v51, %v886_v47  ;;  %v1563_v54 = vpop.f32.mrb[3].mxu0 }
 0x2da   : > { %v967_v55 = vadd.f32 %v1371_v52, %v957_v53 }
 0x2dc   : > { %1075 = vst [vmem:[#allocation3] sm:$0xff] %v967_v55  ;;  %1073 = vst [vmem:[%s606_s12] sm:$0xff] %v967_v55  ;;  %1597 = vmatmul.mubr.f32.vlgmr.msra.gmra.mrb[4].mxu1 %v967_v55 }
 0x3af   : > { %v1057_v57 = vpop.f32.mrb[4].mxu1 }
 0x3b0   : > { %v1058_v58 = vadd.f32 %v1372_v56, %v1057_v57  ;;  %v1598_v59 = vpop.f32.mrb[5].mxu1 }
 0x3b2   : > { %1061 = vmax.xlane.f32.xlu0 %v1058_v58 }
 0x43f   : > { %v1062_v60 = vpop.xlane.xlu0 %1061 }
 0x440   : > { %v2696_v61 = vsub.f32 %v1058_v58, %v1062_v60 }
 0x442   : > { %v1064_v62 = vmul.f32 1.442695, %v2696_v61 }
 0x444   : > { %1846 = vpow2.f32 %v1064_v62 }
 0x44e   : > { %v1847_v63 = vpop.eup %1846 }
 0x44f   : > { %1066 = vadd.xlane.f32.xlu0 %v1847_v63 }
 0x450   : > { %2089 = shalt.err (!%p2086_p4)
}
 0x451   : > { %s2090_s10 = scalar_lea.hbm %s2707_s23, 128  ;;  %s2094_s15 = scalar_lea.hbm %s2870_s19, 1024 }
 0x452   : > { %p2091_p6 = scmp.ne.s32.totalorder %s2707_s23, %s2090_s10  ;;  %p2095_p5 = scmp.lt.u32.totalorder %s2707_s23, %s2870_s19 }
 0x453   : > { %p2096_p0 = scmp.lt.u32.totalorder %s2094_s15, %s2090_s10  ;;  %p2098_p8 = scmp.lt.u32.totalorder %s2090_s10, %s2707_s23 }
 0x454   : > { %p2092_p11 = pnand %p2091_p6, %p2871_p1 }
 0x455   : > { %p2097_p7 = por %p2096_p0, %p2095_p5 }
 0x456   : > { %p2093_p12 = pneg %p2092_p11 }
 0x457   : > { %p2099_p3 = por %p2098_p8, %p2097_p7 }
 0x459   : > { %p2100_p10 = pnand %p2099_p3, %p2093_p12 }
 0x45b   : > { %2103 = shalt.err (!%p2100_p10)
}
 0x45c   : > { %1729 = dma.vmem_to_hbm [thread:$0]  (%p2871_p1), %s1116_s17, 128, %s2707_s23, %s2711_s3  }
 0x45d   : > { %s2872_s16 = sld [smem:[#allocation37_spill]]  ;;  %s1129_s15 = sshll.u32 %s606_s12, 4  ;;  %s1130_s15 = int_to_ptr.vmem [resolvable:$true] %s1129_s15 }
 0x45e   : > { %s2104_s10 = scalar_lea.vmem %s1130_s15, 128  ;;  %s2250_s21 = smov [#allocation21]  }
 0x45f   : > { %p2105_p9 = scmp.ne.s32.totalorder %s1130_s15, %s2104_s10  ;;  %s2108_s14 = sshll.u32 %s2250_s21, 4  ;;  %s2109_s14 = int_to_ptr.vmem [resolvable:$false] %s2108_s14 }
 0x460   : > { %s2110_s0 = scalar_lea.vmem %s2109_s14, 256  ;;  %p2111_p4 = scmp.lt.s32.totalorder %s1130_s15, %s2109_s14 }
 0x461   : > { %p2106_p13 = pnand %p2105_p9, %p2871_p1  ;;  %p2112_p6 = scmp.lt.s32.totalorder %s2110_s0, %s2104_s10 }
 0x463   : > { %s2735_s8 = scalar_lea.hbm %s2872_s16, %s2701_s22  ;;  %p2107_p2 = pneg %p2106_p13 }
 0x464   : > { %p2113_p11 = por %p2112_p6, %p2111_p4 }
 0x466   : > { %p2114_p12 = pnand %p2113_p11, %p2107_p2 }
 0x468   : > { %2117 = shalt.err (!%p2114_p12)
}
 0x469   : > { %s2118_s12 = scalar_lea.hbm %s2735_s8, 128  ;;  %s2122_s1 = scalar_lea.hbm %s2872_s16, 1024 }
 0x46a   : > { %p2119_p5 = scmp.ne.s32.totalorder %s2735_s8, %s2118_s12  ;;  %p2123_p8 = scmp.lt.u32.totalorder %s2735_s8, %s2872_s16 }
 0x46b   : > { %p2124_p3 = scmp.lt.u32.totalorder %s2122_s1, %s2118_s12  ;;  %p2126_p9 = scmp.lt.u32.totalorder %s2118_s12, %s2735_s8 }
 0x46c   : > { %p2120_p0 = pnand %p2119_p5, %p2871_p1 }
 0x46d   : > { %p2125_p10 = por %p2124_p3, %p2123_p8 }
 0x46e   : > { %p2121_p7 = pneg %p2120_p0 }
 0x46f   : > { %p2127_p13 = por %p2126_p9, %p2125_p10 }
 0x471   : > { %p2128_p2 = pnand %p2127_p13, %p2121_p7 }
 0x473   : > { %2131 = shalt.err (!%p2128_p2)
}
 0x474   : > { %1730 = dma.vmem_to_hbm [thread:$0]  (%p2871_p1), %s1130_s15, 128, %s2735_s8, %s2711_s3  }
 0x475   : > { %s2873_s0 = scalar_lea.vmem [#allocation18], %s2610_s11  ;;  %s2874_s23 = sld [smem:[#allocation35_spill]] }
 0x476   : > { %s1101_s10 = sshll.u32 %s2873_s0, 4  ;;  %s2875_s1 = smov %s2873_s0  ;;  %s2766_s10 = int_to_ptr.vmem [resolvable:$true] %s1101_s10 }
 0x477   : > { %s1077_s3 = scalar_lea.sflag [#allocation6], %s2607_s20  ;;  %s2132_s8 = scalar_lea.vmem %s2766_s10, 128 }
 0x478   : > { %p2133_p4 = scmp.ne.s32.totalorder %s2766_s10, %s2132_s8  ;;  %s2251_s15 = smov [#allocation18]  }
 0x479   : > { %s2136_s28 = sshll.u32 %s2251_s15, 4  ;;  %s2137_s28 = int_to_ptr.vmem [resolvable:$false] %s2136_s28 }
 0x47a   : > { %p2134_p6 = pnand %p2133_p4, %p2871_p1  ;;  %s2138_s21 = scalar_lea.vmem %s2137_s28, 256 }
 0x47b   : > { %s2764_s17 = scalar_lea.hbm %s2874_s23, %s2701_s22  ;;  %p2139_p12 = scmp.lt.s32.totalorder %s2766_s10, %s2137_s28 }
 0x47c   : > { %p2135_p11 = pneg %p2134_p6  ;;  %p2140_p5 = scmp.lt.s32.totalorder %s2138_s21, %s2132_s8 }
 0x47e   : > { %p2141_p0 = por %p2140_p5, %p2139_p12 }
 0x480   : > { %p2142_p7 = pnand %p2141_p0, %p2135_p11 }
 0x4dc   : > { %v1067_v0 = vpop.xlane.xlu0 %1066 }
 0x4dd   : > { %1848 = vlog2.f32 %v1067_v0 }
 0x4e7   : > { %v1849_v1 = vpop.eup %1848 }
 0x4e8   : > { %v1069_v2 = vmul.f32 0.6931472, %v1849_v1 }
 0x4ea   : > { %v1070_v3 = vsub.f32 %v2696_v61, %v1069_v2 }
 0x4ec   : > { %1071 = vst [vmem:[%s2875_s1] sm:$0xff] %v1070_v3 }
 0x4ed   : > { %2145 = shalt.err (!%p2142_p7)
}
 0x4ee   : > { %s2146_s20 = scalar_lea.hbm %s2764_s17, 128  ;;  %s2150_s0 = scalar_lea.hbm %s2874_s23, 1024 }
 0x4ef   : > { %p2147_p8 = scmp.ne.s32.totalorder %s2764_s17, %s2146_s20  ;;  %p2151_p9 = scmp.lt.u32.totalorder %s2764_s17, %s2874_s23 }
 0x4f0   : > { %p2152_p13 = scmp.lt.u32.totalorder %s2150_s0, %s2146_s20  ;;  %p2154_p4 = scmp.lt.u32.totalorder %s2146_s20, %s2764_s17 }
 0x4f1   : > { %p2148_p3 = pnand %p2147_p8, %p2871_p1 }
 0x4f2   : > { %p2153_p2 = por %p2152_p13, %p2151_p9 }
 0x4f3   : > { %p2149_p10 = pneg %p2148_p3 }
 0x4f4   : > { %p2155_p6 = por %p2154_p4, %p2153_p2 }
 0x4f6   : > { %p2156_p11 = pnand %p2155_p6, %p2149_p10 }
 0x4f8   : > { %2159 = shalt.err (!%p2156_p11)
}
 0x4f9   : > { %1728 = dma.vmem_to_hbm [thread:$0]  (%p2871_p1), %s2766_s10, 128, %s2764_s17, %s1077_s3  }
 0x4fa PF: > { %p1785_p12 = scmp.ge.s32.totalorder %s2234_s30, 2  ;;  %s1141_s1 = sand.u32 1, %s2214_s25  }
 0x4fb   : > { %p2876_p5 = scmp.ne.s32.totalorder %s2855_s24, 0  ;;  %s1142_s8 = scalar_lea.sflag [#allocation6], %s1141_s1 }
 0x4fd   : > { %p1761_p0 = pnand %p1785_p12, %p2876_p5 }
 0x4ff   : > { %2205 = dma.done.wait (!%p1761_p0), %s1142_s8, 128  }
 0x500   : > { %2207 = vsyncadd (!%p1761_p0), %s1142_s8, 4294967168  ;;  %s2877_s15 = sadd.s32 4294967294, %s2234_s30  }
 0x501   : > { %s1150_s28 = sand.u32 1, %s2877_s15  }
 0x502   : > { %s1151_s21 = scalar_lea.sflag [#allocation20], %s1150_s28 }
 0x503   : > { %2209 = dma.done.wait (!%p1761_p0), %s1151_s21, 256  }
 0x504   : > { %2211 = vsyncadd (!%p1761_p0), %s1151_s21, 4294967040  ;;  %s37_s30 = sadd.s32 1, %s2234_s30   ;;  %s2878_s25 = smov %s2218_s26 }
 0x505   : > { %p34_p1 = scmp.ge.s32.totalorder %s37_s30, 10   ;;  %s2879_s26 = smov %s2222_s27 }
 0x506   : > { %s2880_s27 = smov %s2558_s5  ;;  %s2881_s28 = smov %s2230_s29 }
 0x507   : > { %s2882_s29 = smov %s2884_s18  ;;  %36 = sbr.rel (!%p34_p1) target bundleno = 22 (0x16), region = 175 }
 0x50e   :  { %1165 = vsyncpa [#allocation5], 1 }
 0x50f   :  { %1167 = vsyncpa [#allocation5 + $0x1], 1 }
 0x510   :  { %1168 = vsyncpa [#allocation8], 1 }
 0x511   :  { %1169 = vsyncpa [#allocation11], 1 }
 0x512   :  { %1170 = vsyncpa [#allocation14], 1 }
 0x513   :  { %1171 = vsyncpa [#allocation17], 1 }
 0x514   :  { %1172 = vsyncpa [#allocation6], 1 }
 0x515   :  { %1174 = vsyncpa [#allocation6 + $0x1], 1 }
 0x516   :  { %1175 = vsyncpa [#allocation20], 1 }
 0x517   :  { %1177 = vsyncpa [#allocation20 + $0x1], 1 }

</bundles_post_ra>
